<compile_context>
chip_gen: v6e
topology: v6e:2x2x1
jax: 0.10.0
libtpu: 0.0.40
codegen_flags: <defaults>
</compile_context>

<pallas_src>
import functools

import numpy as np

import jax
import jax.numpy as jnp
from jax.experimental import pallas as pl
from jax.experimental.pallas import tpu as pltpu

CFG = [32, 32, 'M', 32, 32, 32, 'M', 32, 32, 32, 'M',
       32, 32, 32, 'M', 32, 32, 32, 32, 32, 32, 32, 32, 'M']
CLAMP_MAX = 1.0
Q_LEVEL = 1000.0
BN_EPS = 1e-5

CMAX = 32                       # channel width (input's 3 channels are zero-padded to 32)
KK = 9 * CMAX                   # 288 = contraction depth of the fused conv matmul
STAGE_H = (32, 16, 8, 4, 2)     # conv spatial size per stage (each 'M' halves it)


def _ceil128(v):
    return ((v + 127) // 128) * 128


STAGE_LB = tuple(_ceil128((h + 2) * (h + 2)) for h in STAGE_H)   # 1280, 384, 128, 128, 128
NUM_CONV = sum(1 for c in CFG if c != 'M')
NUM_POOL_MATS = len(STAGE_H) - 1     # last pool is folded into the classifier epilogue

# Conv tap shifts wrap around the lane ring; wrapped lanes must be zero (masked) lanes.
for _s, _h in enumerate(STAGE_H):
    assert STAGE_LB[_s] > _h * (_h + 3), ("roll wrap-around would alias valid pixels",
                                          _s, _h, STAGE_LB[_s])


def _build_plan():
    plan, h, stage, li = [], 32, 0, 0
    for item in CFG:
        if item == 'M':
            plan.append(('pool', stage, stage, 0))
            stage += 1
            h //= 2
        else:
            plan.append(('conv', li, stage, h))
            li += 1
    return tuple(plan)


PLAN = _build_plan()


# ---------------- Pallas kernels ----------------

def _roll_probe_kernel(x_ref, o_ref):
    o_ref[...] = pltpu.roll(x_ref[...], shift=1, axis=1)


def _detect_roll_semantics():
    """True if pltpu.roll matches jnp.roll sign convention (result[i] = x[i - shift])."""
    x = jax.lax.broadcasted_iota(jnp.float32, (8, 128), 1)
    y = pl.pallas_call(
        _roll_probe_kernel,
        out_shape=jax.ShapeDtypeStruct((8, 128), jnp.float32),
    )(x)
    return bool(float(y[0, 0]) == 127.0)


def _shift_lanes(x, offset, jnp_roll):
    """result[:, q] = x[:, (q - offset) mod L] (shift lane content right by `offset`)."""
    lb = x.shape[-1]
    t = offset % lb
    if t == 0:
        return x
    shift = t if jnp_roll else (lb - t) % lb
    return pltpu.roll(x, shift=shift, axis=1)


def _vgg_fused_kernel(x_ref, w_ref, scale_ref, shift_ref,
                      p0, p1, p2, p3, m0, m1, m2, m3, m4,
                      pv_ref, fcw_ref, fcb_ref, o_ref, bstack_ref,
                      *, plan, jnp_roll, clamp_max, q_level, group):
    """Whole 'test_deep' network for `group` images.

    x_ref:       (G, 32, LB0)  input, channels on sublanes, flat spatial on lanes
                 (pixel (y,x) at lane y*(h+2)+x, all other lanes zero)
    w_ref:       (19, 32, 288) bf16 conv weights, W[co, (ky*3+kx)*32 + ci]
    scale/shift: (19, 32, 1)   f32 folded BatchNorm (conv bias folded into shift)
    p0..p3:      bf16 (LB_in, LB_out) pool matrices (avgpool 2x2 + re-layout)
    m0..m4:      f32 (1, LB) masks of valid conv-output lanes per stage
    pv_ref:      bf16 (128, 128) final 2x2 avgpool selector (feature -> lane 0)
    fcw/fcb:     bf16 (10, 32) / f32 (10, 1) classifier
    o_ref:       (G, 10, 128) logits (only lane 0 meaningful)
    bstack_ref:  bf16 (288, LB0) persistent VMEM scratch holding the 9 shifted slabs
    """
    pool_refs = (p0, p1, p2, p3)
    mask_refs = (m0, m1, m2, m3, m4)

    for g in range(group):
        b = x_ref[g].astype(jnp.bfloat16)                   # (32, LB) running activation
        for kind, idx, stage, h in plan:
            if kind == 'pool':
                if idx >= NUM_POOL_MATS:
                    # final 1x1-output avg-pool is folded into the classifier epilogue
                    continue
                # AvgPool2d(2,2) + re-layout as one deep-K bf16 matmul.
                b = jnp.dot(b, pool_refs[idx][...],
                            preferred_element_type=jnp.float32).astype(jnp.bfloat16)
            else:
                wp = h + 2
                lb = b.shape[-1]
                # Nine shifted views (re-pad folded into the tap offsets; center tap is
                # identity) written straight into the persistent bf16 scratch.
                for ky in range(3):
                    for kx in range(3):
                        t = ky * 3 + kx
                        off = (1 - ky) * wp + (1 - kx)
                        bstack_ref[t * CMAX:(t + 1) * CMAX, :lb] = \
                            _shift_lanes(b, off, jnp_roll)
                acc = jnp.dot(w_ref[idx], bstack_ref[:, :lb],
                              preferred_element_type=jnp.float32)   # (32, LB) f32
                y = acc * scale_ref[idx] + shift_ref[idx]            # folded BN + bias
                y = jnp.clip(y, 0.0, clamp_max)                      # Clamp_q (approx)
                y = jnp.floor(y * q_level) * (1.0 / q_level)
                y = y * mask_refs[stage][...]                        # zero invalid lanes
                b = y.astype(jnp.bfloat16)
        # classifier1: final 2x2 avg-pool via selector matmul, then Linear(32, 10).
        pooled = jnp.dot(b, pv_ref[...],
                         preferred_element_type=jnp.float32)         # (32, 128), lane 0
        z = jnp.dot(fcw_ref[...], pooled.astype(jnp.bfloat16),
                    preferred_element_type=jnp.float32)              # (10, 128)
        o_ref[g] = z + fcb_ref[...]


# ---------------- host-side constant builders ----------------

def _pool_matrix(h_in, lb_in, lb_out):
    """AvgPool2d(2,2) + re-layout, both sides in unpadded-origin layout."""
    wp_in, h_out = h_in + 2, h_in // 2
    wp_out = h_out + 2
    p = np.zeros((lb_in, lb_out), np.float32)
    for y2 in range(h_out):
        for x2 in range(h_out):
            dst = y2 * wp_out + x2
            for dy in (0, 1):
                for dx in (0, 1):
                    src = (2 * y2 + dy) * wp_in + (2 * x2 + dx)
                    p[src, dst] = 0.25
    return jnp.asarray(p, jnp.bfloat16)        # 0.25 is exact in bf16


def _conv_mask(h, lb):
    wp = h + 2
    m = np.zeros((1, lb), np.float32)
    for y in range(h):
        for x in range(h):
            m[0, y * wp + x] = 1.0
    return jnp.asarray(m)


def _final_pool_vec(lb):
    """Final 2x2 avg-pool over the h=2 stage; result lands in lane 0."""
    wp = STAGE_H[-1] + 2
    v = np.zeros((lb, 128), np.float32)
    for y in range(2):
        for x in range(2):
            v[y * wp + x, 0] = 0.25
    return jnp.asarray(v, jnp.bfloat16)


def build_constants():
    pool_mats = [_pool_matrix(STAGE_H[s], STAGE_LB[s], STAGE_LB[s + 1])
                 for s in range(NUM_POOL_MATS)]
    masks = [_conv_mask(h, STAGE_LB[s]) for s, h in enumerate(STAGE_H)]
    pool_vec = _final_pool_vec(STAGE_LB[-1])
    return pool_mats, masks, pool_vec


def _pack_input(x_nchw):
    """NCHW input -> (N, 32, LB0): zero-padded channels, pixel (y,x) at lane y*34+x."""
    n = x_nchw.shape[0]
    hp = STAGE_H[0] + 2
    buf = jnp.zeros((n, CMAX, hp, hp), jnp.float32)
    buf = buf.at[:, :3, :STAGE_H[0], :STAGE_H[0]].set(x_nchw.astype(jnp.float32))
    buf = buf.reshape(n, CMAX, hp * hp)
    pad = STAGE_LB[0] - hp * hp
    if pad:
        buf = jnp.pad(buf, ((0, 0), (0, 0), (0, pad)))
    return buf


# ---------------- parameters ----------------

def init_params(key):
    convs = []
    in_ch = 3
    for item in CFG:
        if item == 'M':
            continue
        out_ch = item
        key, k = jax.random.split(key)
        fan_in = in_ch * 9
        # kaiming_normal_(mode='fan_in', nonlinearity='relu') -> std = sqrt(2/fan_in)
        w = jax.random.normal(k, (3, 3, in_ch, out_ch), jnp.float32) * jnp.sqrt(2.0 / fan_in)
        bias = jnp.zeros((out_ch,), jnp.float32)              # init.constant_(0)
        gamma = jnp.ones((out_ch,), jnp.float32)              # fresh BatchNorm2d (eval)
        beta = jnp.zeros((out_ch,), jnp.float32)
        mean = jnp.zeros((out_ch,), jnp.float32)
        var = jnp.ones((out_ch,), jnp.float32)
        scale = gamma / jnp.sqrt(var + BN_EPS)
        shift = (bias - mean) * scale + beta
        convs.append(dict(w=w, scale=scale, shift=shift))
        in_ch = out_ch
    key, k1, k2 = jax.random.split(key, 3)
    bound = float(1.0 / np.sqrt(32.0))                        # PyTorch default Linear init
    fc_w = jax.random.uniform(k1, (10, 32), jnp.float32, -bound, bound)
    fc_b = jax.random.uniform(k2, (10,), jnp.float32, -bound, bound)
    return convs, fc_w, fc_b


def pack_params(convs, fc_w, fc_b):
    ws, scs, shs = [], [], []
    for p in convs:
        w = p['w']
        cin = w.shape[2]
        wp_ = jnp.zeros((3, 3, CMAX, CMAX), jnp.float32).at[:, :, :cin, :].set(w)
        ws.append(jnp.transpose(wp_, (3, 0, 1, 2)).reshape(CMAX, KK))   # (32, 288)
        scs.append(p['scale'].reshape(CMAX, 1))
        shs.append(p['shift'].reshape(CMAX, 1))
    return (jnp.stack(ws).astype(jnp.bfloat16),               # MXU operands -> bf16
            jnp.stack(scs), jnp.stack(shs),                   # VPU epilogue stays f32
            fc_w.astype(jnp.bfloat16), fc_b.reshape(10, 1).astype(jnp.float32))


# ---------------- forward ----------------

def _pick_group(n):
    """Images per grid step; keep >= 2 grid steps so v7x megacore still splits the batch."""
    for g in (8, 4, 2):
        if n % g == 0 and n // g >= 2:
            return g
    return 1


def vgg_forward(x_nchw, packed, pool_mats, masks, pool_vec, jnp_roll):
    conv_w, conv_scale, conv_shift, fc_w, fc_b = packed
    n = x_nchw.shape[0]
    g = _pick_group(n)
    x0 = _pack_input(x_nchw)

    kernel = functools.partial(
        _vgg_fused_kernel, plan=PLAN, jnp_roll=jnp_roll,
        clamp_max=CLAMP_MAX, q_level=Q_LEVEL, group=g)

    in_specs = [
        pl.BlockSpec((g, CMAX, STAGE_LB[0]), lambda i: (i, 0, 0)),
        pl.BlockSpec((NUM_CONV, CMAX, KK), lambda i: (0, 0, 0)),
        pl.BlockSpec((NUM_CONV, CMAX, 1), lambda i: (0, 0, 0)),
        pl.BlockSpec((NUM_CONV, CMAX, 1), lambda i: (0, 0, 0)),
    ]
    in_specs += [pl.BlockSpec(pm.shape, lambda i: (0, 0)) for pm in pool_mats]
    in_specs += [pl.BlockSpec(mk.shape, lambda i: (0, 0)) for mk in masks]
    in_specs += [pl.BlockSpec(pool_vec.shape, lambda i: (0, 0)),
                 pl.BlockSpec((10, CMAX), lambda i: (0, 0)),
                 pl.BlockSpec((10, 1), lambda i: (0, 0))]

    out = pl.pallas_call(
        kernel,
        out_shape=jax.ShapeDtypeStruct((n, 10, 128), jnp.float32),
        grid=(n // g,),
        in_specs=in_specs,
        out_specs=pl.BlockSpec((g, 10, 128), lambda i: (i, 0, 0)),
        scratch_shapes=[pltpu.VMEM((KK, STAGE_LB[0]), jnp.bfloat16)],
        compiler_params=pltpu.CompilerParams(
            dimension_semantics=("parallel",),
            vmem_limit_bytes=24 * 1024 * 1024),
    )(x0, conv_w, conv_scale, conv_shift, *pool_mats, *masks, pool_vec, fc_w, fc_b)
    return out[:, :, 0]


# ---------------- pure-JAX reference (for a self-check) ----------------

def vgg_reference(x_nchw, convs, fc_w, fc_b):
    x = x_nchw.astype(jnp.float32)
    li = 0
    for item in CFG:
        if item == 'M':
            n, c, h, w = x.shape
            x = x.reshape(n, c, h // 2, 2, w // 2, 2).mean(axis=(3, 5))
        else:
            p = convs[li]
            li += 1
            y = jax.lax.conv_general_dilated(
                x, p['w'], window_strides=(1, 1), padding=((1, 1), (1, 1)),
                dimension_numbers=('NCHW', 'HWIO', 'NCHW'),
                precision=jax.lax.Precision.HIGHEST)
            y = y * p['scale'].reshape(1, -1, 1, 1) + p['shift'].reshape(1, -1, 1, 1)
            y = jnp.clip(y, 0.0, CLAMP_MAX)
            y = jnp.floor(y * Q_LEVEL) * (1.0 / Q_LEVEL)
            x = y
    feat = x.reshape(x.shape[0], -1)                                   # (N, 32)
    return jnp.dot(feat, fc_w.T, precision=jax.lax.Precision.HIGHEST) + fc_b


if __name__ == "__main__":
    key = jax.random.PRNGKey(0)
    kx, kp = jax.random.split(key)
    # CIFAR-10 sized input (required so the flattened feature is exactly 32 -> Linear(32,10)).
    x = jax.random.normal(kx, (2, 3, 32, 32), jnp.float32)

    convs, fc_w, fc_b = init_params(kp)
    packed = pack_params(convs, fc_w, fc_b)
    pool_mats, masks, pool_vec = build_constants()

    jnp_roll = _detect_roll_semantics()        # one tiny probe, run once at setup

    out = jax.block_until_ready(
        vgg_forward(x, packed, pool_mats, masks, pool_vec, jnp_roll))
    assert out.shape == (2, 10) and out.dtype == jnp.float32

    # bf16 MXU operands (vs the f32 HIGHEST reference) keep logits within ~1e-2;
    # the 1e-1 tolerance catches structural bugs.
    ref = jax.block_until_ready(vgg_reference(x, convs, fc_w, fc_b))
    np.testing.assert_allclose(np.asarray(out), np.asarray(ref), atol=1e-1, rtol=0.0)

    print("KERNEL_OK")
</pallas_src>

<mosaic_0001>
module attributes {stable_mosaic.version = 11 : i64} {
  func.func @_roll_probe_kernel(%arg0: memref<8x128xf32, #tpu.memory_space<vmem>>, %arg1: memref<8x128xf32, #tpu.memory_space<vmem>>) attributes {dimension_semantics = [], scalar_prefetch = 0 : i64, scratch_operands = 0 : i64, tpu.core_type = #tpu.core_type<tc>} {
    %c0 = arith.constant 0 : index
    %c0_0 = arith.constant 0 : index
    %0 = vector.load %arg0[%c0, %c0_0] : memref<8x128xf32, #tpu.memory_space<vmem>>, vector<8x128xf32>
    %c1_i32 = arith.constant 1 : i32
    %1 = tpu.dynamic_rotate %0 by %c1_i32 dim 1 : vector<8x128xf32>, i32 -> vector<8x128xf32>
    %c0_1 = arith.constant 0 : index
    %c0_2 = arith.constant 0 : index
    %2 = vector.load %arg1[%c0_1, %c0_2] : memref<8x128xf32, #tpu.memory_space<vmem>>, vector<8x128xf32>
    tpu.vector_store %arg1[%c0_1, %c0_2], %1 {strides = array<i32>} : memref<8x128xf32, #tpu.memory_space<vmem>>, vector<8x128xf32>,
    return
  }
}

</mosaic_0001>

<bundles_post_ra>
// kernel: tpu_custom_call.1
= control target key start
LH: loop header
LB: loop body
LE: loop exit
PB: predicated region body
PF: predicated region fallthrough
CT: control target
= control target key end

     0   :  { %6 = vsyncpa [#allocation3], 0  ;;  %s106_s0 = inlined_call_operand.hbm [shape: f32[8,128], index: 0, kind: input, shape index: {}]   ;;  %s107_s1 = inlined_call_operand.hbm [shape: f32[8,128], index: 1, kind: output, shape index: {}]  }
   0x1   :  { %7 = vsyncpa [#allocation4], 0  ;;  %s87_s6 = smov [#allocation2]  }
   0x2   :  { %s14_s7 = sshll.u32 %s87_s6, 4  ;;  %s15_s7 = int_to_ptr.vmem [resolvable:$true] %s14_s7 }
   0x3   :  { %s51_s8 = scalar_lea.vmem %s15_s7, 128  ;;  %p56_p1 = scmp.lt.s32.totalorder %s15_s7, %s15_s7 }
   0x4   :  { %p52_p0 = scmp.ne.s32.totalorder %s15_s7, %s51_s8  ;;  %p57_p2 = scmp.lt.s32.totalorder %s51_s8, %s51_s8 }
   0x6   :  { %p58_p3 = por %p57_p2, %p56_p1 }
   0x8   :  { %p59_p4 = pnand %p58_p3, %p52_p0 }
   0xa   :  { %62 = shalt.err (!%p59_p4)
}
   0xb   :  { %17 = dma.hbm_to_vmem [thread:$0]  %s106_s0, 128, %s15_s7, [#allocation3]  }
   0xc   :  { %83 = dma.done.wait [#allocation3], 128  }
   0xd   :  { %84 = vsyncadd [#allocation3], 4294967168  ;;  %v21_v0 = vld [vmem:[#allocation2] sm:$0xff]  ;;  %s88_s11 = smov 1   ;;  %s89_s12 = smov [#allocation5]  }
   0xe   :  { %22 = vrot.lane.b32.xlu0 %v21_v0, %s88_s11  ;;  %s31_s13 = sshll.u32 %s89_s12, 4  ;;  %s32_s13 = int_to_ptr.vmem [resolvable:$true] %s31_s13 }
   0xf   :  { %s63_s14 = scalar_lea.vmem %s32_s13, 128  ;;  %p68_p6 = scmp.lt.s32.totalorder %s32_s13, %s32_s13 }
  0x10   :  { %p64_p5 = scmp.ne.s32.totalorder %s32_s13, %s63_s14  ;;  %p69_p7 = scmp.lt.s32.totalorder %s63_s14, %s63_s14 }
  0x12   :  { %p70_p8 = por %p69_p7, %p68_p6 }
  0x14   :  { %p71_p9 = pnand %p70_p8, %p64_p5 }
  0x80   :  { %v23_v1 = vpop.permute.xlu0 %22 }
  0x81   :  { %24 = vst [vmem:[#allocation5] sm:$0xff] %v23_v1 }
  0x82   :  { %74 = shalt.err (!%p71_p9)
}
  0x83   :  { %34 = dma.vmem_to_hbm [thread:$0]  %s32_s13, 128, %s107_s1, [#allocation4]  }
  0x84   :  { %85 = dma.done.wait [#allocation4], 128  }
  0x85   :  { %86 = vsyncadd [#allocation4], 4294967168 }
  0x86   :  { %38 = vsyncpa [#allocation3], 1 }
  0x87   :  { %39 = vsyncpa [#allocation4], 1 }

</bundles_post_ra>
